<compile_context>
chip_gen: v5e
topology: v5e:2x2
jax: 0.10.0
libtpu: 0.0.40
codegen_flags: <defaults>
</compile_context>

<pallas_src>
import functools

import numpy as np
import jax
import jax.numpy as jnp
from jax.experimental import pallas as pl
from jax.experimental.pallas import tpu as pltpu


def _attention_kernel(x_ref, wqkv_ref, bqkv_ref, wproj_ref, bproj_ref, o_ref,
                      ctx_ref, *, num_heads, scale):
    n, c = x_ref.shape[1], x_ref.shape[2]
    d = c // num_heads
    cdt = x_ref.dtype              # MXU operand dtype == input dtype (bf16-ready)

    x = x_ref[0]                                                   # (N, C)

    # Fused QKV projection: operands in the input dtype, f32 accumulation.
    qkv = jnp.dot(x, wqkv_ref[...], preferred_element_type=jnp.float32)
    qkv = qkv + bqkv_ref[...].astype(jnp.float32)                  # (N, 3C), f32

    # Per-head attention, statically unrolled (num_heads is small & static).
    # TODO(synk): for long sequences (N >~ 2k) switch to a query-tile grid
    # axis + flash-style online softmax so the (N, N) scores never fully
    # materialize (v7x only has 64 MiB VMEM).
    for h in range(num_heads):
        # Scale folded into q: N*D multiplies instead of N*N per head.
        qh = (qkv[:, h * d:(h + 1) * d] * scale).astype(cdt)           # (N, D)
        kh = qkv[:, c + h * d:c + (h + 1) * d].astype(cdt)             # (N, D)
        vh = qkv[:, 2 * c + h * d:2 * c + (h + 1) * d].astype(cdt)     # (N, D)

        # s = q @ k^T (contract last dims of both; no transpose op).
        s = jax.lax.dot_general(qh, kh, (((1,), (1,)), ((), ())),
                                preferred_element_type=jnp.float32)    # (N, N)
        # Softmax numerator / denominator in f32; normalization deferred.
        s = s - jnp.max(s, axis=-1, keepdims=True)
        p = jnp.exp(s)                                                 # (N, N)
        l = jnp.sum(p, axis=-1, keepdims=True)                         # (N, 1)

        # Unnormalized PV matmul (input-dtype operands, f32 accumulation),
        # then normalize the small (N, D) result with an EUP reciprocal
        # instead of dividing the (N, N) probability matrix.
        ctx_h = jnp.dot(p.astype(cdt), vh, preferred_element_type=jnp.float32)
        ctx_h = ctx_h * pl.reciprocal(l, approx=True)                  # (N, D)

        # Write this head's context into its lane slice of the VMEM scratch
        # accumulator right away (bounds live ranges; no concat at the end).
        ctx_ref[:, h * d:(h + 1) * d] = ctx_h.astype(cdt)

    # Output projection.
    out = jnp.dot(ctx_ref[...], wproj_ref[...],
                  preferred_element_type=jnp.float32)
    out = out + bproj_ref[...].astype(jnp.float32)                     # (N, C)
    o_ref[0] = out.astype(o_ref.dtype)


def attention_forward(x, w_qkv, b_qkv, w_proj, b_proj, num_heads):
    """x: (B, N, C); w_qkv: (C, 3C); b_qkv: (3C,); w_proj: (C, C); b_proj: (C,)."""
    B, N, C = x.shape
    assert C % num_heads == 0, "dim should be divisible by num_heads"
    scale = float((C // num_heads) ** -0.5)

    kernel = functools.partial(
        _attention_kernel, num_heads=num_heads, scale=scale)

    # Explicit VMEM budget (review feedback): weights & x/out blocks are
    # double-buffered by the default pipeline; the f32 qkv / score / prob
    # temporaries and the ctx scratch live on top.  2x slack covers (8, 128)
    # tile padding and spills; clamp to [32 MiB, 64 MiB] so we never go below
    # the platform defaults nor above v7x's physical VMEM.
    in_b = np.dtype(x.dtype).itemsize
    w_b = np.dtype(w_qkv.dtype).itemsize
    est = (2 * (C * 3 * C + 3 * C + C * C + C) * w_b      # weights + biases (x2 buf)
           + 2 * 2 * N * C * in_b                          # x / out blocks   (x2 buf)
           + N * C * in_b                                  # ctx scratch
           + (N * 3 * C + 2 * N * N + 3 * N * C) * 4)      # f32 temporaries
    vmem_limit = int(min(max(2 * est, 32 * 1024 * 1024), 64 * 1024 * 1024))

    # TODO(synk): mark the constant-index weight BlockSpecs with
    # pipeline_mode=pl.Buffered(1) (single-buffer) once verified on the target
    # jax version; halves the resident weight footprint on v7x.
    return pl.pallas_call(
        kernel,
        out_shape=jax.ShapeDtypeStruct((B, N, C), x.dtype),
        grid=(B,),
        in_specs=[
            pl.BlockSpec((1, N, C), lambda b: (b, 0, 0)),      # x (one sample / step)
            pl.BlockSpec((C, 3 * C), lambda b: (0, 0)),        # w_qkv (resident)
            pl.BlockSpec((1, 3 * C), lambda b: (0, 0)),        # b_qkv
            pl.BlockSpec((C, C), lambda b: (0, 0)),            # w_proj
            pl.BlockSpec((1, C), lambda b: (0, 0)),            # b_proj
        ],
        out_specs=pl.BlockSpec((1, N, C), lambda b: (b, 0, 0)),
        scratch_shapes=[pltpu.VMEM((N, C), x.dtype)],          # per-head ctx accum
        compiler_params=pltpu.CompilerParams(
            dimension_semantics=("parallel",),                 # megacore batch shard
            vmem_limit_bytes=vmem_limit,
        ),
    )(x, w_qkv, b_qkv.reshape(1, 3 * C), w_proj, b_proj.reshape(1, C))


class Attention:
    """Pallas TPU implementation of the CACO Attention module forward (eval)."""

    def __init__(self, dim, num_heads=8, qkv_bias=False,
                 attn_drop=0.0, proj_drop=0.0, *, key=None, dtype=jnp.float32):
        assert dim % num_heads == 0, "dim should be divisible by num_heads"
        self.dim = dim
        self.num_heads = num_heads
        # Inference forward: nn.Dropout is identity in eval mode regardless of
        # p, so attn_drop / proj_drop are recorded but never applied.
        # TODO(synk): training-mode dropout (p > 0) would need a
        # host-generated mask operand; no in-kernel PRNG is used.
        self.attn_drop = attn_drop
        self.proj_drop = proj_drop

        if key is None:
            key = jax.random.PRNGKey(0)
        k1, k2, k3, k4 = jax.random.split(key, 4)
        lim = 1.0 / np.sqrt(dim)
        # Weights stored already-transposed (in_features, out_features) so the
        # kernel computes x @ W directly (== torch's x @ weight.T).
        self.w_qkv = jax.random.uniform(
            k1, (dim, 3 * dim), jnp.float32, -lim, lim).astype(dtype)
        self.b_qkv = (jax.random.uniform(
            k2, (3 * dim,), jnp.float32, -lim, lim).astype(dtype)
            if qkv_bias else jnp.zeros((3 * dim,), dtype))
        self.w_proj = jax.random.uniform(
            k3, (dim, dim), jnp.float32, -lim, lim).astype(dtype)
        self.b_proj = jax.random.uniform(
            k4, (dim,), jnp.float32, -lim, lim).astype(dtype)

    def __call__(self, x):
        return attention_forward(x, self.w_qkv, self.b_qkv,
                                 self.w_proj, self.b_proj, self.num_heads)


def _attention_ref(x, w_qkv, b_qkv, w_proj, b_proj, num_heads):
    """Pure-JAX reference mirroring the PyTorch forward exactly."""
    B, N, C = x.shape
    D = C // num_heads
    qkv = x @ w_qkv + b_qkv                                    # (B, N, 3C)
    qkv = qkv.reshape(B, N, 3, num_heads, D).transpose(2, 0, 3, 1, 4)
    q, k, v = qkv[0], qkv[1], qkv[2]                           # (B, H, N, D)
    attn = (q @ jnp.swapaxes(k, -1, -2)) * (D ** -0.5)         # (B, H, N, N)
    attn = jax.nn.softmax(attn, axis=-1)
    out = (attn @ v).transpose(0, 2, 1, 3).reshape(B, N, C)    # (B, N, C)
    return out @ w_proj + b_proj


if __name__ == "__main__":
    key = jax.random.PRNGKey(0)
    kx, kp = jax.random.split(key)

    B, N, C, H = 2, 8, 32, 8
    x = jax.random.normal(kx, (B, N, C), dtype=jnp.float32)

    # f32 path.  Tolerance is set by the approximate EUP reciprocal used for
    # the deferred softmax normalization (everything else is exact f32 math).
    attn = Attention(dim=C, num_heads=H, qkv_bias=True, key=kp)
    y = jax.block_until_ready(attn(x))
    y_ref = _attention_ref(x, attn.w_qkv, attn.b_qkv,
                           attn.w_proj, attn.b_proj, H)
    np.testing.assert_allclose(np.asarray(y), np.asarray(y_ref),
                               rtol=5e-3, atol=5e-3)

    # bf16 path: operands feed the MXU in bf16 (its peak dtype); softmax math
    # and matmul accumulation stay f32 inside the kernel.
    attn_bf16 = Attention(dim=C, num_heads=H, qkv_bias=True, key=kp,
                          dtype=jnp.bfloat16)
    x_bf16 = x.astype(jnp.bfloat16)
    y_bf16 = jax.block_until_ready(attn_bf16(x_bf16))
    y_bf16_ref = _attention_ref(x_bf16.astype(jnp.float32),
                                attn_bf16.w_qkv.astype(jnp.float32),
                                attn_bf16.b_qkv.astype(jnp.float32),
                                attn_bf16.w_proj.astype(jnp.float32),
                                attn_bf16.b_proj.astype(jnp.float32), H)
    np.testing.assert_allclose(np.asarray(y_bf16.astype(jnp.float32)),
                               np.asarray(y_bf16_ref), rtol=1e-1, atol=1e-1)

    print("KERNEL_OK")
</pallas_src>

<mosaic_0001>
module attributes {stable_mosaic.version = 11 : i64} {
  func.func @_attention_kernel(%arg0: i32, %arg1: memref<1x8x32xf32, #tpu.memory_space<vmem>>, %arg2: memref<32x96xf32, #tpu.memory_space<vmem>>, %arg3: memref<1x96xf32, #tpu.memory_space<vmem>>, %arg4: memref<32x32xf32, #tpu.memory_space<vmem>>, %arg5: memref<1x32xf32, #tpu.memory_space<vmem>>, %arg6: memref<1x8x32xf32, #tpu.memory_space<vmem>>, %arg7: memref<8x32xf32, #tpu.memory_space<vmem>>) attributes {dimension_semantics = [#tpu.dimension_semantics<parallel>], iteration_bounds = array<i64: 2>, scalar_prefetch = 0 : i64, scratch_operands = 1 : i64, tpu.core_type = #tpu.core_type<tc>, window_params = [{transform_indices = @transform_0, window_bounds = array<i64: 1, 8, 32>}, {pipeline_mode = #tpu.pipeline_mode<synchronous>, transform_indices = @transform_1, window_bounds = array<i64: 32, 96>}, {pipeline_mode = #tpu.pipeline_mode<synchronous>, transform_indices = @transform_2, window_bounds = array<i64: 1, 96>}, {pipeline_mode = #tpu.pipeline_mode<synchronous>, transform_indices = @transform_3, window_bounds = array<i64: 32, 32>}, {pipeline_mode = #tpu.pipeline_mode<synchronous>, transform_indices = @transform_4, window_bounds = array<i64: 1, 32>}, {transform_indices = @transform_5, window_bounds = array<i64: 1, 8, 32>}]} {
    %c0 = arith.constant 0 : index
    %c0_0 = arith.constant 0 : index
    %c0_1 = arith.constant 0 : index
    %0 = vector.load %arg1[%c0, %c0_0, %c0_1] : memref<1x8x32xf32, #tpu.memory_space<vmem>>, vector<1x8x32xf32>
    %1 = vector.shape_cast %0 : vector<1x8x32xf32> to vector<8x32xf32>
    %c0_2 = arith.constant 0 : index
    %c0_3 = arith.constant 0 : index
    %2 = vector.load %arg2[%c0_2, %c0_3] : memref<32x96xf32, #tpu.memory_space<vmem>>, vector<32x96xf32>
    %cst = arith.constant dense<0.000000e+00> : vector<8x96xf32>
    %3 = tpu.matmul %1, %2, %cst {dimension_numbers = #tpu.dot_dimension_numbers<[1], [0], [0], [1], [0, 0, 1, 1], [], []>} : vector<8x32xf32>, vector<32x96xf32>, vector<8x96xf32> -> vector<8x96xf32>
    %c0_4 = arith.constant 0 : index
    %c0_5 = arith.constant 0 : index
    %4 = vector.load %arg3[%c0_4, %c0_5] : memref<1x96xf32, #tpu.memory_space<vmem>>, vector<1x96xf32>
    %5 = vector.broadcast %4 : vector<1x96xf32> to vector<8x96xf32>
    %6 = arith.addf %3, %5 : vector<8x96xf32>
    %7 = vector.extract_strided_slice %6 {offsets = [0, 0], sizes = [8, 4], strides = [1, 1]} : vector<8x96xf32> to vector<8x4xf32>
    %cst_6 = arith.constant 5.000000e-01 : f32
    %8 = vector.broadcast %cst_6 : f32 to vector<8x4xf32>
    %9 = arith.mulf %7, %8 : vector<8x4xf32>
    %10 = vector.extract_strided_slice %6 {offsets = [0, 32], sizes = [8, 4], strides = [1, 1]} : vector<8x96xf32> to vector<8x4xf32>
    %11 = vector.extract_strided_slice %6 {offsets = [0, 64], sizes = [8, 4], strides = [1, 1]} : vector<8x96xf32> to vector<8x4xf32>
    %cst_7 = arith.constant dense<0.000000e+00> : vector<8x8xf32>
    %12 = tpu.matmul %9, %10, %cst_7 {dimension_numbers = #tpu.dot_dimension_numbers<[1], [1], [0], [0], [0, 0, 1, 0], [], []>} : vector<8x4xf32>, vector<8x4xf32>, vector<8x8xf32> -> vector<8x8xf32>
    %cst_8 = arith.constant dense<0xFF800000> : vector<8xf32>
    %13 = vector.multi_reduction <maximumf>, %12, %cst_8 [1] : vector<8x8xf32> to vector<8xf32>
    %14 = vector.shape_cast %13 : vector<8xf32> to vector<8x1xf32>
    %15 = vector.broadcast %14 : vector<8x1xf32> to vector<8x8xf32>
    %16 = arith.subf %12, %15 : vector<8x8xf32>
    %17 = math.exp %16 : vector<8x8xf32>
    %cst_9 = arith.constant dense<0.000000e+00> : vector<8xf32>
    %18 = vector.multi_reduction <add>, %17, %cst_9 [1] : vector<8x8xf32> to vector<8xf32>
    %19 = vector.shape_cast %18 : vector<8xf32> to vector<8x1xf32>
    %cst_10 = arith.constant dense<0.000000e+00> : vector<8x4xf32>
    %20 = tpu.matmul %17, %11, %cst_10 {dimension_numbers = #tpu.dot_dimension_numbers<[1], [0], [0], [1], [0, 0, 1, 1], [], []>} : vector<8x8xf32>, vector<8x4xf32>, vector<8x4xf32> -> vector<8x4xf32>
    %21 = tpu.reciprocal %19 {approx = true} : vector<8x1xf32> -> vector<8x1xf32>
    %22 = vector.broadcast %21 : vector<8x1xf32> to vector<8x4xf32>
    %23 = arith.mulf %20, %22 : vector<8x4xf32>
    %c0_11 = arith.constant 0 : index
    %c0_12 = arith.constant 0 : index
    %24 = vector.load %arg7[%c0_11, %c0_12] : memref<8x32xf32, #tpu.memory_space<vmem>>, vector<8x4xf32>
    tpu.vector_store %arg7[%c0_11, %c0_12], %23 {strides = array<i32>} : memref<8x32xf32, #tpu.memory_space<vmem>>, vector<8x4xf32>,
    %25 = vector.extract_strided_slice %6 {offsets = [0, 4], sizes = [8, 4], strides = [1, 1]} : vector<8x96xf32> to vector<8x4xf32>
    %cst_13 = arith.constant 5.000000e-01 : f32
    %26 = vector.broadcast %cst_13 : f32 to vector<8x4xf32>
    %27 = arith.mulf %25, %26 : vector<8x4xf32>
    %28 = vector.extract_strided_slice %6 {offsets = [0, 36], sizes = [8, 4], strides = [1, 1]} : vector<8x96xf32> to vector<8x4xf32>
    %29 = vector.extract_strided_slice %6 {offsets = [0, 68], sizes = [8, 4], strides = [1, 1]} : vector<8x96xf32> to vector<8x4xf32>
    %cst_14 = arith.constant dense<0.000000e+00> : vector<8x8xf32>
    %30 = tpu.matmul %27, %28, %cst_14 {dimension_numbers = #tpu.dot_dimension_numbers<[1], [1], [0], [0], [0, 0, 1, 0], [], []>} : vector<8x4xf32>, vector<8x4xf32>, vector<8x8xf32> -> vector<8x8xf32>
    %cst_15 = arith.constant dense<0xFF800000> : vector<8xf32>
    %31 = vector.multi_reduction <maximumf>, %30, %cst_15 [1] : vector<8x8xf32> to vector<8xf32>
    %32 = vector.shape_cast %31 : vector<8xf32> to vector<8x1xf32>
    %33 = vector.broadcast %32 : vector<8x1xf32> to vector<8x8xf32>
    %34 = arith.subf %30, %33 : vector<8x8xf32>
    %35 = math.exp %34 : vector<8x8xf32>
    %cst_16 = arith.constant dense<0.000000e+00> : vector<8xf32>
    %36 = vector.multi_reduction <add>, %35, %cst_16 [1] : vector<8x8xf32> to vector<8xf32>
    %37 = vector.shape_cast %36 : vector<8xf32> to vector<8x1xf32>
    %cst_17 = arith.constant dense<0.000000e+00> : vector<8x4xf32>
    %38 = tpu.matmul %35, %29, %cst_17 {dimension_numbers = #tpu.dot_dimension_numbers<[1], [0], [0], [1], [0, 0, 1, 1], [], []>} : vector<8x8xf32>, vector<8x4xf32>, vector<8x4xf32> -> vector<8x4xf32>
    %39 = tpu.reciprocal %37 {approx = true} : vector<8x1xf32> -> vector<8x1xf32>
    %40 = vector.broadcast %39 : vector<8x1xf32> to vector<8x4xf32>
    %41 = arith.mulf %38, %40 : vector<8x4xf32>
    %c0_18 = arith.constant 0 : index
    %c4 = arith.constant 4 : index
    %42 = vector.load %arg7[%c0_18, %c4] : memref<8x32xf32, #tpu.memory_space<vmem>>, vector<8x4xf32>
    tpu.vector_store %arg7[%c0_18, %c4], %41 {strides = array<i32>} : memref<8x32xf32, #tpu.memory_space<vmem>>, vector<8x4xf32>,
    %43 = vector.extract_strided_slice %6 {offsets = [0, 8], sizes = [8, 4], strides = [1, 1]} : vector<8x96xf32> to vector<8x4xf32>
    %cst_19 = arith.constant 5.000000e-01 : f32
    %44 = vector.broadcast %cst_19 : f32 to vector<8x4xf32>
    %45 = arith.mulf %43, %44 : vector<8x4xf32>
    %46 = vector.extract_strided_slice %6 {offsets = [0, 40], sizes = [8, 4], strides = [1, 1]} : vector<8x96xf32> to vector<8x4xf32>
    %47 = vector.extract_strided_slice %6 {offsets = [0, 72], sizes = [8, 4], strides = [1, 1]} : vector<8x96xf32> to vector<8x4xf32>
    %cst_20 = arith.constant dense<0.000000e+00> : vector<8x8xf32>
    %48 = tpu.matmul %45, %46, %cst_20 {dimension_numbers = #tpu.dot_dimension_numbers<[1], [1], [0], [0], [0, 0, 1, 0], [], []>} : vector<8x4xf32>, vector<8x4xf32>, vector<8x8xf32> -> vector<8x8xf32>
    %cst_21 = arith.constant dense<0xFF800000> : vector<8xf32>
    %49 = vector.multi_reduction <maximumf>, %48, %cst_21 [1] : vector<8x8xf32> to vector<8xf32>
    %50 = vector.shape_cast %49 : vector<8xf32> to vector<8x1xf32>
    %51 = vector.broadcast %50 : vector<8x1xf32> to vector<8x8xf32>
    %52 = arith.subf %48, %51 : vector<8x8xf32>
    %53 = math.exp %52 : vector<8x8xf32>
    %cst_22 = arith.constant dense<0.000000e+00> : vector<8xf32>
    %54 = vector.multi_reduction <add>, %53, %cst_22 [1] : vector<8x8xf32> to vector<8xf32>
    %55 = vector.shape_cast %54 : vector<8xf32> to vector<8x1xf32>
    %cst_23 = arith.constant dense<0.000000e+00> : vector<8x4xf32>
    %56 = tpu.matmul %53, %47, %cst_23 {dimension_numbers = #tpu.dot_dimension_numbers<[1], [0], [0], [1], [0, 0, 1, 1], [], []>} : vector<8x8xf32>, vector<8x4xf32>, vector<8x4xf32> -> vector<8x4xf32>
    %57 = tpu.reciprocal %55 {approx = true} : vector<8x1xf32> -> vector<8x1xf32>
    %58 = vector.broadcast %57 : vector<8x1xf32> to vector<8x4xf32>
    %59 = arith.mulf %56, %58 : vector<8x4xf32>
    %c0_24 = arith.constant 0 : index
    %c8 = arith.constant 8 : index
    %60 = vector.load %arg7[%c0_24, %c8] : memref<8x32xf32, #tpu.memory_space<vmem>>, vector<8x4xf32>
    tpu.vector_store %arg7[%c0_24, %c8], %59 {strides = array<i32>} : memref<8x32xf32, #tpu.memory_space<vmem>>, vector<8x4xf32>,
    %61 = vector.extract_strided_slice %6 {offsets = [0, 12], sizes = [8, 4], strides = [1, 1]} : vector<8x96xf32> to vector<8x4xf32>
    %cst_25 = arith.constant 5.000000e-01 : f32
    %62 = vector.broadcast %cst_25 : f32 to vector<8x4xf32>
    %63 = arith.mulf %61, %62 : vector<8x4xf32>
    %64 = vector.extract_strided_slice %6 {offsets = [0, 44], sizes = [8, 4], strides = [1, 1]} : vector<8x96xf32> to vector<8x4xf32>
    %65 = vector.extract_strided_slice %6 {offsets = [0, 76], sizes = [8, 4], strides = [1, 1]} : vector<8x96xf32> to vector<8x4xf32>
    %cst_26 = arith.constant dense<0.000000e+00> : vector<8x8xf32>
    %66 = tpu.matmul %63, %64, %cst_26 {dimension_numbers = #tpu.dot_dimension_numbers<[1], [1], [0], [0], [0, 0, 1, 0], [], []>} : vector<8x4xf32>, vector<8x4xf32>, vector<8x8xf32> -> vector<8x8xf32>
    %cst_27 = arith.constant dense<0xFF800000> : vector<8xf32>
    %67 = vector.multi_reduction <maximumf>, %66, %cst_27 [1] : vector<8x8xf32> to vector<8xf32>
    %68 = vector.shape_cast %67 : vector<8xf32> to vector<8x1xf32>
    %69 = vector.broadcast %68 : vector<8x1xf32> to vector<8x8xf32>
    %70 = arith.subf %66, %69 : vector<8x8xf32>
    %71 = math.exp %70 : vector<8x8xf32>
    %cst_28 = arith.constant dense<0.000000e+00> : vector<8xf32>
    %72 = vector.multi_reduction <add>, %71, %cst_28 [1] : vector<8x8xf32> to vector<8xf32>
    %73 = vector.shape_cast %72 : vector<8xf32> to vector<8x1xf32>
    %cst_29 = arith.constant dense<0.000000e+00> : vector<8x4xf32>
    %74 = tpu.matmul %71, %65, %cst_29 {dimension_numbers = #tpu.dot_dimension_numbers<[1], [0], [0], [1], [0, 0, 1, 1], [], []>} : vector<8x8xf32>, vector<8x4xf32>, vector<8x4xf32> -> vector<8x4xf32>
    %75 = tpu.reciprocal %73 {approx = true} : vector<8x1xf32> -> vector<8x1xf32>
    %76 = vector.broadcast %75 : vector<8x1xf32> to vector<8x4xf32>
    %77 = arith.mulf %74, %76 : vector<8x4xf32>
    %c0_30 = arith.constant 0 : index
    %c12 = arith.constant 12 : index
    %78 = vector.load %arg7[%c0_30, %c12] : memref<8x32xf32, #tpu.memory_space<vmem>>, vector<8x4xf32>
    tpu.vector_store %arg7[%c0_30, %c12], %77 {strides = array<i32>} : memref<8x32xf32, #tpu.memory_space<vmem>>, vector<8x4xf32>,
    %79 = vector.extract_strided_slice %6 {offsets = [0, 16], sizes = [8, 4], strides = [1, 1]} : vector<8x96xf32> to vector<8x4xf32>
    %cst_31 = arith.constant 5.000000e-01 : f32
    %80 = vector.broadcast %cst_31 : f32 to vector<8x4xf32>
    %81 = arith.mulf %79, %80 : vector<8x4xf32>
    %82 = vector.extract_strided_slice %6 {offsets = [0, 48], sizes = [8, 4], strides = [1, 1]} : vector<8x96xf32> to vector<8x4xf32>
    %83 = vector.extract_strided_slice %6 {offsets = [0, 80], sizes = [8, 4], strides = [1, 1]} : vector<8x96xf32> to vector<8x4xf32>
    %cst_32 = arith.constant dense<0.000000e+00> : vector<8x8xf32>
    %84 = tpu.matmul %81, %82, %cst_32 {dimension_numbers = #tpu.dot_dimension_numbers<[1], [1], [0], [0], [0, 0, 1, 0], [], []>} : vector<8x4xf32>, vector<8x4xf32>, vector<8x8xf32> -> vector<8x8xf32>
    %cst_33 = arith.constant dense<0xFF800000> : vector<8xf32>
    %85 = vector.multi_reduction <maximumf>, %84, %cst_33 [1] : vector<8x8xf32> to vector<8xf32>
    %86 = vector.shape_cast %85 : vector<8xf32> to vector<8x1xf32>
    %87 = vector.broadcast %86 : vector<8x1xf32> to vector<8x8xf32>
    %88 = arith.subf %84, %87 : vector<8x8xf32>
    %89 = math.exp %88 : vector<8x8xf32>
    %cst_34 = arith.constant dense<0.000000e+00> : vector<8xf32>
    %90 = vector.multi_reduction <add>, %89, %cst_34 [1] : vector<8x8xf32> to vector<8xf32>
    %91 = vector.shape_cast %90 : vector<8xf32> to vector<8x1xf32>
    %cst_35 = arith.constant dense<0.000000e+00> : vector<8x4xf32>
    %92 = tpu.matmul %89, %83, %cst_35 {dimension_numbers = #tpu.dot_dimension_numbers<[1], [0], [0], [1], [0, 0, 1, 1], [], []>} : vector<8x8xf32>, vector<8x4xf32>, vector<8x4xf32> -> vector<8x4xf32>
    %93 = tpu.reciprocal %91 {approx = true} : vector<8x1xf32> -> vector<8x1xf32>
    %94 = vector.broadcast %93 : vector<8x1xf32> to vector<8x4xf32>
    %95 = arith.mulf %92, %94 : vector<8x4xf32>
    %c0_36 = arith.constant 0 : index
    %c16 = arith.constant 16 : index
    %96 = vector.load %arg7[%c0_36, %c16] : memref<8x32xf32, #tpu.memory_space<vmem>>, vector<8x4xf32>
    tpu.vector_store %arg7[%c0_36, %c16], %95 {strides = array<i32>} : memref<8x32xf32, #tpu.memory_space<vmem>>, vector<8x4xf32>,
    %97 = vector.extract_strided_slice %6 {offsets = [0, 20], sizes = [8, 4], strides = [1, 1]} : vector<8x96xf32> to vector<8x4xf32>
    %cst_37 = arith.constant 5.000000e-01 : f32
    %98 = vector.broadcast %cst_37 : f32 to vector<8x4xf32>
    %99 = arith.mulf %97, %98 : vector<8x4xf32>
    %100 = vector.extract_strided_slice %6 {offsets = [0, 52], sizes = [8, 4], strides = [1, 1]} : vector<8x96xf32> to vector<8x4xf32>
    %101 = vector.extract_strided_slice %6 {offsets = [0, 84], sizes = [8, 4], strides = [1, 1]} : vector<8x96xf32> to vector<8x4xf32>
    %cst_38 = arith.constant dense<0.000000e+00> : vector<8x8xf32>
    %102 = tpu.matmul %99, %100, %cst_38 {dimension_numbers = #tpu.dot_dimension_numbers<[1], [1], [0], [0], [0, 0, 1, 0], [], []>} : vector<8x4xf32>, vector<8x4xf32>, vector<8x8xf32> -> vector<8x8xf32>
    %cst_39 = arith.constant dense<0xFF800000> : vector<8xf32>
    %103 = vector.multi_reduction <maximumf>, %102, %cst_39 [1] : vector<8x8xf32> to vector<8xf32>
    %104 = vector.shape_cast %103 : vector<8xf32> to vector<8x1xf32>
    %105 = vector.broadcast %104 : vector<8x1xf32> to vector<8x8xf32>
    %106 = arith.subf %102, %105 : vector<8x8xf32>
    %107 = math.exp %106 : vector<8x8xf32>
    %cst_40 = arith.constant dense<0.000000e+00> : vector<8xf32>
    %108 = vector.multi_reduction <add>, %107, %cst_40 [1] : vector<8x8xf32> to vector<8xf32>
    %109 = vector.shape_cast %108 : vector<8xf32> to vector<8x1xf32>
    %cst_41 = arith.constant dense<0.000000e+00> : vector<8x4xf32>
    %110 = tpu.matmul %107, %101, %cst_41 {dimension_numbers = #tpu.dot_dimension_numbers<[1], [0], [0], [1], [0, 0, 1, 1], [], []>} : vector<8x8xf32>, vector<8x4xf32>, vector<8x4xf32> -> vector<8x4xf32>
    %111 = tpu.reciprocal %109 {approx = true} : vector<8x1xf32> -> vector<8x1xf32>
    %112 = vector.broadcast %111 : vector<8x1xf32> to vector<8x4xf32>
    %113 = arith.mulf %110, %112 : vector<8x4xf32>
    %c0_42 = arith.constant 0 : index
    %c20 = arith.constant 20 : index
    %114 = vector.load %arg7[%c0_42, %c20] : memref<8x32xf32, #tpu.memory_space<vmem>>, vector<8x4xf32>
    tpu.vector_store %arg7[%c0_42, %c20], %113 {strides = array<i32>} : memref<8x32xf32, #tpu.memory_space<vmem>>, vector<8x4xf32>,
    %115 = vector.extract_strided_slice %6 {offsets = [0, 24], sizes = [8, 4], strides = [1, 1]} : vector<8x96xf32> to vector<8x4xf32>
    %cst_43 = arith.constant 5.000000e-01 : f32
    %116 = vector.broadcast %cst_43 : f32 to vector<8x4xf32>
    %117 = arith.mulf %115, %116 : vector<8x4xf32>
    %118 = vector.extract_strided_slice %6 {offsets = [0, 56], sizes = [8, 4], strides = [1, 1]} : vector<8x96xf32> to vector<8x4xf32>
    %119 = vector.extract_strided_slice %6 {offsets = [0, 88], sizes = [8, 4], strides = [1, 1]} : vector<8x96xf32> to vector<8x4xf32>
    %cst_44 = arith.constant dense<0.000000e+00> : vector<8x8xf32>
    %120 = tpu.matmul %117, %118, %cst_44 {dimension_numbers = #tpu.dot_dimension_numbers<[1], [1], [0], [0], [0, 0, 1, 0], [], []>} : vector<8x4xf32>, vector<8x4xf32>, vector<8x8xf32> -> vector<8x8xf32>
    %cst_45 = arith.constant dense<0xFF800000> : vector<8xf32>
    %121 = vector.multi_reduction <maximumf>, %120, %cst_45 [1] : vector<8x8xf32> to vector<8xf32>
    %122 = vector.shape_cast %121 : vector<8xf32> to vector<8x1xf32>
    %123 = vector.broadcast %122 : vector<8x1xf32> to vector<8x8xf32>
    %124 = arith.subf %120, %123 : vector<8x8xf32>
    %125 = math.exp %124 : vector<8x8xf32>
    %cst_46 = arith.constant dense<0.000000e+00> : vector<8xf32>
    %126 = vector.multi_reduction <add>, %125, %cst_46 [1] : vector<8x8xf32> to vector<8xf32>
    %127 = vector.shape_cast %126 : vector<8xf32> to vector<8x1xf32>
    %cst_47 = arith.constant dense<0.000000e+00> : vector<8x4xf32>
    %128 = tpu.matmul %125, %119, %cst_47 {dimension_numbers = #tpu.dot_dimension_numbers<[1], [0], [0], [1], [0, 0, 1, 1], [], []>} : vector<8x8xf32>, vector<8x4xf32>, vector<8x4xf32> -> vector<8x4xf32>
    %129 = tpu.reciprocal %127 {approx = true} : vector<8x1xf32> -> vector<8x1xf32>
    %130 = vector.broadcast %129 : vector<8x1xf32> to vector<8x4xf32>
    %131 = arith.mulf %128, %130 : vector<8x4xf32>
    %c0_48 = arith.constant 0 : index
    %c24 = arith.constant 24 : index
    %132 = vector.load %arg7[%c0_48, %c24] : memref<8x32xf32, #tpu.memory_space<vmem>>, vector<8x4xf32>
    tpu.vector_store %arg7[%c0_48, %c24], %131 {strides = array<i32>} : memref<8x32xf32, #tpu.memory_space<vmem>>, vector<8x4xf32>,
    %133 = vector.extract_strided_slice %6 {offsets = [0, 28], sizes = [8, 4], strides = [1, 1]} : vector<8x96xf32> to vector<8x4xf32>
    %cst_49 = arith.constant 5.000000e-01 : f32
    %134 = vector.broadcast %cst_49 : f32 to vector<8x4xf32>
    %135 = arith.mulf %133, %134 : vector<8x4xf32>
    %136 = vector.extract_strided_slice %6 {offsets = [0, 60], sizes = [8, 4], strides = [1, 1]} : vector<8x96xf32> to vector<8x4xf32>
    %137 = vector.extract_strided_slice %6 {offsets = [0, 92], sizes = [8, 4], strides = [1, 1]} : vector<8x96xf32> to vector<8x4xf32>
    %cst_50 = arith.constant dense<0.000000e+00> : vector<8x8xf32>
    %138 = tpu.matmul %135, %136, %cst_50 {dimension_numbers = #tpu.dot_dimension_numbers<[1], [1], [0], [0], [0, 0, 1, 0], [], []>} : vector<8x4xf32>, vector<8x4xf32>, vector<8x8xf32> -> vector<8x8xf32>
    %cst_51 = arith.constant dense<0xFF800000> : vector<8xf32>
    %139 = vector.multi_reduction <maximumf>, %138, %cst_51 [1] : vector<8x8xf32> to vector<8xf32>
    %140 = vector.shape_cast %139 : vector<8xf32> to vector<8x1xf32>
    %141 = vector.broadcast %140 : vector<8x1xf32> to vector<8x8xf32>
    %142 = arith.subf %138, %141 : vector<8x8xf32>
    %143 = math.exp %142 : vector<8x8xf32>
    %cst_52 = arith.constant dense<0.000000e+00> : vector<8xf32>
    %144 = vector.multi_reduction <add>, %143, %cst_52 [1] : vector<8x8xf32> to vector<8xf32>
    %145 = vector.shape_cast %144 : vector<8xf32> to vector<8x1xf32>
    %cst_53 = arith.constant dense<0.000000e+00> : vector<8x4xf32>
    %146 = tpu.matmul %143, %137, %cst_53 {dimension_numbers = #tpu.dot_dimension_numbers<[1], [0], [0], [1], [0, 0, 1, 1], [], []>} : vector<8x8xf32>, vector<8x4xf32>, vector<8x4xf32> -> vector<8x4xf32>
    %147 = tpu.reciprocal %145 {approx = true} : vector<8x1xf32> -> vector<8x1xf32>
    %148 = vector.broadcast %147 : vector<8x1xf32> to vector<8x4xf32>
    %149 = arith.mulf %146, %148 : vector<8x4xf32>
    %c0_54 = arith.constant 0 : index
    %c28 = arith.constant 28 : index
    %150 = vector.load %arg7[%c0_54, %c28] : memref<8x32xf32, #tpu.memory_space<vmem>>, vector<8x4xf32>
    tpu.vector_store %arg7[%c0_54, %c28], %149 {strides = array<i32>} : memref<8x32xf32, #tpu.memory_space<vmem>>, vector<8x4xf32>,
    %c0_55 = arith.constant 0 : index
    %c0_56 = arith.constant 0 : index
    %151 = vector.load %arg7[%c0_55, %c0_56] : memref<8x32xf32, #tpu.memory_space<vmem>>, vector<8x32xf32>
    %c0_57 = arith.constant 0 : index
    %c0_58 = arith.constant 0 : index
    %152 = vector.load %arg4[%c0_57, %c0_58] : memref<32x32xf32, #tpu.memory_space<vmem>>, vector<32x32xf32>
    %cst_59 = arith.constant dense<0.000000e+00> : vector<8x32xf32>
    %153 = tpu.matmul %151, %152, %cst_59 {dimension_numbers = #tpu.dot_dimension_numbers<[1], [0], [0], [1], [0, 0, 1, 1], [], []>} : vector<8x32xf32>, vector<32x32xf32>, vector<8x32xf32> -> vector<8x32xf32>
    %c0_60 = arith.constant 0 : index
    %c0_61 = arith.constant 0 : index
    %154 = vector.load %arg5[%c0_60, %c0_61] : memref<1x32xf32, #tpu.memory_space<vmem>>, vector<1x32xf32>
    %155 = vector.broadcast %154 : vector<1x32xf32> to vector<8x32xf32>
    %156 = arith.addf %153, %155 : vector<8x32xf32>
    %c0_62 = arith.constant 0 : index
    %c0_63 = arith.constant 0 : index
    %c0_64 = arith.constant 0 : index
    %157 = vector.load %arg6[%c0_62, %c0_63, %c0_64] : memref<1x8x32xf32, #tpu.memory_space<vmem>>, vector<1x8x32xf32>
    %158 = vector.shape_cast %157 : vector<1x8x32xf32> to vector<8x32xf32>
    %159 = vector.shape_cast %156 : vector<8x32xf32> to vector<1x8x32xf32>
    tpu.vector_store %arg6[%c0_62, %c0_63, %c0_64], %159 {strides = array<i32>} : memref<1x8x32xf32, #tpu.memory_space<vmem>>, vector<1x8x32xf32>,
    return
  }
  func.func @transform_0(%arg0: i32) -> (i32, i32, i32) {
    %c0_i32 = arith.constant 0 : i32
    %c0_i32_0 = arith.constant 0 : i32
    %c0_i32_1 = arith.constant 0 : i32
    return %arg0, %c0_i32, %c0_i32_0 : i32, i32, i32
  }
  func.func @transform_1(%arg0: i32) -> (i32, i32) {
    %c0_i32 = arith.constant 0 : i32
    %c0_i32_0 = arith.constant 0 : i32
    %c0_i32_1 = arith.constant 0 : i32
    return %c0_i32, %c0_i32_0 : i32, i32
  }
  func.func @transform_2(%arg0: i32) -> (i32, i32) {
    %c0_i32 = arith.constant 0 : i32
    %c0_i32_0 = arith.constant 0 : i32
    %c0_i32_1 = arith.constant 0 : i32
    return %c0_i32, %c0_i32_0 : i32, i32
  }
  func.func @transform_3(%arg0: i32) -> (i32, i32) {
    %c0_i32 = arith.constant 0 : i32
    %c0_i32_0 = arith.constant 0 : i32
    %c0_i32_1 = arith.constant 0 : i32
    return %c0_i32, %c0_i32_0 : i32, i32
  }
  func.func @transform_4(%arg0: i32) -> (i32, i32) {
    %c0_i32 = arith.constant 0 : i32
    %c0_i32_0 = arith.constant 0 : i32
    %c0_i32_1 = arith.constant 0 : i32
    return %c0_i32, %c0_i32_0 : i32, i32
  }
  func.func @transform_5(%arg0: i32) -> (i32, i32, i32) {
    %c0_i32 = arith.constant 0 : i32
    %c0_i32_0 = arith.constant 0 : i32
    %c0_i32_1 = arith.constant 0 : i32
    return %arg0, %c0_i32, %c0_i32_0 : i32, i32, i32
  }
}

</mosaic_0001>

<bundles_post_ra>
// kernel: tpu_custom_call.1
= control target key start
LH: loop header
LB: loop body
LE: loop exit
PB: predicated region body
PF: predicated region fallthrough
CT: control target
= control target key end

     0   :  { %10 = vsyncpa [#allocation4], 0  ;;  %s1643_s0 = inlined_call_operand.hbm [shape: f32[2,8,32], index: 0, kind: input, shape index: {}]   ;;  %s1644_s1 = inlined_call_operand.hbm [shape: f32[32,96], index: 1, kind: input, shape index: {}]   ;;  %s1645_s2 = inlined_call_operand.vmem [shape: f32[1,96], index: 2, kind: input, shape index: {}]   ;;  %s1646_s3 = inlined_call_operand.hbm [shape: f32[32,32], index: 3, kind: input, shape index: {}]   ;;  %s1647_s4 = inlined_call_operand.vmem [shape: f32[1,32], index: 4, kind: input, shape index: {}]   ;;  %s1648_s5 = inlined_call_operand.hbm [shape: f32[2,8,32], index: 5, kind: output, shape index: {}]  }
   0x1   :  { %12 = vsyncpa [#allocation4 + $0x1], 0 }
   0x2   :  { %13 = vsyncpa [#allocation7], 0 }
   0x3   :  { %14 = vsyncpa [#allocation5], 0 }
   0x4   :  { %16 = vsyncpa [#allocation5 + $0x1], 0  ;;  %s1413_s18 = smov 0   ;;  %s1415_s19 = smov 0  }
   0x5   :  { %s1417_s20 = smov 0   ;;  %s1419_s21 = smov 0  }
   0x6 LB: > { %s174_s24 = sshll.u32 %s1644_s1, 4  ;;  %s1437_s25 = sadd.s32 4294967295, %s1347_s21   ;;  %s1347_s21 = sphi %s1419_s21, %s1659_s21   ;;  %s1343_s20 = sphi %s1417_s20, %s1658_s20   ;;  %s1339_s19 = sphi %s1415_s19, %s1657_s19   ;;  %s1335_s18 = sphi %s1413_s18, %s1656_s18   ;;  %s175_s24 = int_to_ptr.hbm [resolvable:$true] %s174_s24 }
   0x7   : > { %p1013_p0 = scmp.ge.s32.totalorder %s1347_s21, 1  ;;  %p43_p1 = scmp.eq.s32.totalorder %s1437_s25, 0 }
   0x8   : > { %p163_p2 = scmp.lt.s32.totalorder %s1347_s21, 3  ;;  %s1349_s27 = smov [#allocation6]  }
   0x9   : > { %s176_s28 = sshll.u32 %s1349_s27, 4  ;;  %s191_s6 = sshll.u32 %s1646_s3, 4  ;;  %s177_s28 = int_to_ptr.vmem [resolvable:$true] %s176_s28  ;;  %s192_s6 = int_to_ptr.hbm [resolvable:$true] %s191_s6 }
   0xa   : > { %p1442_p3 = pnand %p1013_p0, %p163_p2  ;;  %s1350_s7 = smov [#allocation8]  }
   0xb   : > { %s193_s8 = sshll.u32 %s1350_s7, 4  ;;  %s1351_s9 = smov 128   ;;  %s194_s8 = int_to_ptr.vmem [resolvable:$true] %s193_s8 }
   0xc   : > { %p1066_p4 = pneg %p1442_p3  ;;  %s1352_s10 = smov 8  }
   0xd   : > { %s1012_s11 = sadd.s32 4294967294, %s1347_s21   ;;  %s1456_s12 = sadd.s32 1, %s1347_s21  }
   0xe   : > { %p1067_p6 = pnand %p1066_p4, %p43_p1  ;;  %s26_s13 = ssub.s32 %s1347_s21, %s1456_s12 }
   0xf   : > { %s29_s14 = sadd.s32 1, %s1343_s20  ;;  %p27_p7 = scmp.eq.s32.totalorder %s26_s13, 0 }
  0x10   : > { %1069 = dma.hbm_to_vmem [thread:$0]  (!%p1067_p6), %s175_s24, 512, %s177_s28, [#allocation7], %s1351_s9, %s1351_s9, %s1352_s10  }
  0x11   : > { %1072 = dma.hbm_to_vmem [thread:$0]  (!%p1067_p6), %s192_s6, 512, %s194_s8, [#allocation7], %s1351_s9, %s1351_s9, %s1352_s10  }
  0x12   : > { %p36_p8 = scmp.ne.s32.totalorder %s1343_s20, %s1339_s19  ;;  %p37_p9 = scmp.eq.s32.totalorder %s1347_s21, 0 }
  0x13   : > { %p42_p10 = scmp.ne.s32.totalorder %s1339_s19, %s1335_s18  ;;  %p150_p13 = scmp.eq.s32.totalorder %s1437_s25, 1 }
  0x14   : > { %s1467_s15 = scalar_select %p27_p7, %s1343_s20, %s29_s14  }
  0x15   : > { %p1469_p11 = por %p37_p9, %p36_p8  ;;  %p1475_p12 = por %p43_p1, %p42_p10 }
  0x16   : > { %p156_p0 = scmp.eq.s32.totalorder %s1012_s11, 1  ;;  %p1083_p2 = scmp.lt.s32.totalorder %s1347_s21, 2 }
  0x17   : > { %s210_s22 = sand.u32 1, %s1343_s20   ;;  %p1482_p4 = por %p150_p13, %p36_p8 }
  0x18   : > { %p1486_p6 = por %p156_p0, %p42_p10  ;;  %s1017_s27 = sshll.u32 %s210_s22, 3 }
  0x19   : > { %s1018_s28 = sshll.u32 %s1347_s21, 3  ;;  %s214_s7 = scalar_lea.vmem [#allocation3], %s1017_s27 }
  0x1a   : > { %s218_s6 = scalar_lea.hbm %s1643_s0, %s1018_s28  ;;  %s222_s8 = sshll.u32 %s214_s7, 4  ;;  %s223_s8 = int_to_ptr.vmem [resolvable:$true] %s222_s8 }
  0x1b   : > { %s220_s9 = sshll.u32 %s218_s6, 4  ;;  %p1496_p7 = pnand %p1083_p2, %p1469_p11  ;;  %s221_s9 = int_to_ptr.hbm [resolvable:$true] %s220_s9 }
  0x1c   : > { %s211_s11 = scalar_lea.sflag [#allocation4], %s210_s22  ;;  %s1247_s13 = sshra.s32 %s221_s9, 4  ;;  %s1248_s13 = int_to_ptr.hbm [resolvable:$true] %s1247_s13 }
  0x1d   : > { %s1249_s14 = scalar_lea.hbm %s1248_s13, 8  ;;  %p1251_p9 = pneg %p1496_p7 }
  0x1e   : > { %p1250_p8 = scmp.ne.s32.totalorder %s1248_s13, %s1249_s14  ;;  %s1254_s29 = scalar_lea.hbm %s1643_s0, 16 }
  0x1f   : > { %p1255_p11 = scmp.lt.s32.totalorder %s1248_s13, %s1643_s0  ;;  %p1256_p0 = scmp.lt.s32.totalorder %s1254_s29, %s1249_s14 }
  0x20   : > { %p1252_p10 = pnand %p1251_p9, %p1250_p8 }
  0x21   : > { %p1257_p2 = por %p1256_p0, %p1255_p11 }
  0x22   : > { %p1253_p13 = pneg %p1252_p10 }
  0x24   : > { %p1258_p5 = pnand %p1257_p2, %p1253_p13 }
  0x26   : > { %1261 = shalt.err (!%p1258_p5)
}
  0x27   : > { %1076 = dma.hbm_to_vmem [thread:$0]  (!%p1496_p7), %s221_s9, 128, %s223_s8, %s211_s11  }
  0x28   : > { %231 = sbr.rel (%p1442_p3) target bundleno = 1027 (0x403), region = 40  ;;  %s1513_s22 = sand.u32 (!%p1442_p3), 1, %s1339_s19  }
  0x29   : > { %s1020_s6 = sshll.u32 (!%p1442_p3), %s1513_s22, 3  ;;  %s234_s7 = scalar_lea.sflag (!%p1442_p3), [#allocation4], %s1513_s22 }
  0x2a   : > { %s237_s13 = scalar_lea.vmem (!%p1442_p3), [#allocation3], %s1020_s6 }
  0x2d   : > { %1322 = dma.done.wait (%p1475_p12), %s234_s7, 128  }
  0x2e   : > { %1324 = vsyncadd (%p1475_p12), %s234_s7, 4294967168 }
  0x2f   : > { %1326 = dma.done.wait (%p43_p1), [#allocation7], 1024  }
  0x30   : > { %1328 = vsyncadd (%p43_p1), [#allocation7], 4294966272  ;;  %v279_v0 = vld [vmem:[#allocation6 + $0x18] sm:$0xff]  ;;  %v278_v1 = vld [vmem:[#allocation6 + $0x10] sm:$0xff]  ;;  %vm284_vm0 = vcmask 261120   ;;  %s1353_s8 = smov 84  }
  0x31   : > { %300 = vmatpush.msra.mxu0 %v279_v0  ;;  %v277_v2 = vld [vmem:[#allocation6 + $0x8] sm:$0xff]  ;;  %v276_v3 = vld [vmem:[#allocation6] sm:$0xff]  ;;  %v275_v4 = vld [vmem:[%s237_s13] sm:$0xff]  ;;  %s1354_s9 = smov 96   ;;  %s1355_s10 = smov 124   ;;  %vm312_vm1 = vcmask 31744  }
  0x32   : > { %v1153_v5 = vld [vmem:[%s1645_s2] ss:$0 sm:$0xff]  ;;  %s1356_s11 = smov 92   ;;  %s1357_s14 = smov 120   ;;  %vm338_vm2 = vcmask 64512   ;;  %vm446_vm3 = vcmask 64544  }
  0x33   : > { %301 = vmatpush.msra.mxu0 %v278_v1  ;;  %s1358_s27 = smov 88   ;;  %s1359_s28 = smov 116   ;;  %vm517_vm4 = vcmask 97344   ;;  %vm588_vm5 = vcmask 130144   ;;  %vm659_vm6 = vcmask 162944   ;;  %vm730_vm7 = vcmask 195744  }
  0x34   : > { %s1360_s29 = smov 76   ;;  %s1361_s30 = smov 80   ;;  %vm801_vm8 = vcmask 228544   ;;  %vm872_vm9 = vcmask 261344  }
  0x35   : > { %302 = vmatpush.msra.mxu0 %v277_v2  ;;  %s1362_s16 = smov 112   ;;  %s1363_s7 = smov 72  }
  0x36   : > { %s1364_s13 = smov 108   ;;  %s1365_s26 = smov 68  }
  0x37   : > { %303 = vmatpush.msra.mxu0 %v276_v3  ;;  %s1366_s17 = smov 100  }
  0x38   : > { %1024 = vmatmul.msk.f32.vlgmr.msra.gmra.mxu0 %vm284_vm0, %v275_v4 }
  0xb5   : > { %v305_v6 = vpop.f32.mrf.mxu0 }
  0xb6   : > { %v1531_v7 = vadd.f32 %v1153_v5, %v305_v6 }
  0xb8   : > { %521 = vrot.lane.b32.xlu2 %v1531_v7, %s1353_s8  ;;  %310 = vrot.lane.b32.xlu0 %v1531_v7, %s1354_s9  ;;  %v308_v8 = vmul.f32 0.5, %v1531_v7  ;;  %s1367_s8 = smov 104   ;;  %s1368_s9 = smov 64  }
  0xba   : > { %377 = vrot.lane.b32.xlu1 %v308_v8, %s1355_s10  ;;  %s1369_s10 = smov 56  }
  0xc0   : > { %379 = vrot.lane.b32.xlu0 %v1531_v7, %s1356_s11  ;;  %448 = vrot.lane.b32.xlu2 %v308_v8, %s1357_s14  ;;  %s1370_s11 = smov 52   ;;  %s1371_s14 = smov 60  }
  0xc2   : > { %450 = vrot.lane.b32.xlu1 %v1531_v7, %s1358_s27  ;;  %s1372_s27 = smov 48  }
  0xc8   : > { %519 = vrot.lane.b32.xlu0 %v308_v8, %s1359_s28  ;;  %663 = vrot.lane.b32.xlu2 %v1531_v7, %s1360_s29  ;;  %s1373_s28 = smov 44   ;;  %s1374_s29 = smov 40  }
  0xca   : > { %592 = vrot.lane.b32.xlu1 %v1531_v7, %s1361_s30  ;;  %s1375_s30 = smov 36  }
  0xd0   : > { %590 = vrot.lane.b32.xlu0 %v308_v8, %s1362_s16  ;;  %734 = vrot.lane.b32.xlu2 %v1531_v7, %s1363_s7  ;;  %s1376_s16 = smov 8   ;;  %s1377_s7 = smov 16  }
  0xd2   : > { %661 = vrot.lane.b32.xlu1 %v308_v8, %s1364_s13  ;;  %s1378_s13 = smov 4  }
  0xd8   : > { %805 = vrot.lane.b32.xlu0 %v1531_v7, %s1365_s26  ;;  %803 = vrot.lane.b32.xlu2 %v308_v8, %s1366_s17  ;;  %s1379_s26 = smov 12   ;;  %s1380_s17 = smov 20  }
  0xda   : > { %732 = vrot.lane.b32.xlu1 %v308_v8, %s1367_s8  ;;  %s1381_s8 = smov 24  }
  0xe0   : > { %348 = vrot.lane.b32.xlu2 %v1531_v7, %s1368_s9  ;;  %s1382_s9 = smov 28  }
  0xe8   : > { %485 = vrot.lane.b32.xlu2 %v1531_v7, %s1369_s10  ;;  %s1051_s10 = sshll.u32 %s1437_s25, 3  ;;  %s908_s25 = scalar_lea.sflag [#allocation5], %s1513_s22 }
 0x112   : > { %v522_v9 = vpop.permute.xlu2 %521 }
 0x113   : > { %1034 = vmatpush.xpose.msk.msrb.mxu0 %vm312_vm1, %v522_v9 }
 0x11a   : > { %v449_v10 = vpop.permute.xlu2 %448 }
 0x122   : > { %v664_v11 = vpop.permute.xlu2 %663 }
 0x123   : > { %1040 = vmatpush.xpose.msk.msra.mxu0 %vm312_vm1, %v664_v11 }
 0x12a   : > { %v311_v12 = vpop.permute.xlu0 %310  ;;  %v735_v13 = vpop.permute.xlu2 %734 }
 0x12b   : > { %1025 = vmatpush.xpose.msk.msra.mxu1 %vm312_vm1, %v311_v12 }
 0x12c   : > { %v378_v14 = vpop.permute.xlu1 %377 }
 0x12e   : > { %1026 = vmatmul.msk.f32.vlgmr.msra.gmra.mxu1 %vm312_vm1, %v308_v8 }
 0x132   : > { %v380_v15 = vpop.permute.xlu0 %379  ;;  %v804_v16 = vpop.permute.xlu2 %803 }
 0x133   : > { %1028 = vmatpush.xpose.msk.msra.mxu3 %vm312_vm1, %v380_v15 }
 0x134   : > { %v451_v17 = vpop.permute.xlu1 %450 }
 0x135   : > { %1031 = vmatpush.xpose.msk.msrb.mxu1 %vm312_vm1, %v451_v17 }
 0x136   : > { %1029 = vmatmul.msk.f32.vlgmr.msra.gmra.mxu3 %vm312_vm1, %v378_v14 }
 0x138   : > { %1032 = vmatmul.msk.f32.vlgmr.msrb.gmra.mxu1 %vm312_vm1, %v449_v10 }
 0x13a   : > { %v520_v18 = vpop.permute.xlu0 %519  ;;  %v349_v19 = vpop.permute.xlu2 %348 }
 0x13b   : > { %369 = vmatpush.msra.mxu2 %v349_v19  ;;  %1035 = vmatmul.msk.f32.vlgmr.msrb.gmra.mxu0 %vm312_vm1, %v520_v18 }
 0x13c   : > { %v593_v20 = vpop.permute.xlu1 %592 }
 0x13d   : > { %1037 = vmatpush.xpose.msk.msra.mxu1 %vm312_vm1, %v593_v20 }
 0x141   : > { %1043 = vmatpush.xpose.msk.msrb.mxu1 %vm312_vm1, %v735_v13 }
 0x142   : > { %v591_v21 = vpop.permute.xlu0 %590  ;;  %v486_v22 = vpop.permute.xlu2 %485 }
 0x143   : > { %506 = vmatpush.msrb.mxu3 %v486_v22  ;;  %1038 = vmatmul.msk.f32.vlgmr.msra.gmra.mxu1 %vm312_vm1, %v591_v21 }
 0x144   : > { %v662_v23 = vpop.permute.xlu1 %661 }
 0x145   : > { %1041 = vmatmul.msk.f32.vlgmr.msra.gmra.mxu0 %vm312_vm1, %v662_v23 }
 0x14a   : > { %v806_v24 = vpop.permute.xlu0 %805 }
 0x14b   : > { %1046 = vmatpush.xpose.msk.msrb.mxu0 %vm312_vm1, %v806_v24 }
 0x14c   : > { %v733_v25 = vpop.permute.xlu1 %732 }
 0x14d   : > { %1044 = vmatmul.msk.f32.vlgmr.msrb.gmra.mxu1 %vm312_vm1, %v733_v25 }
 0x14e   : > { %1047 = vmatmul.msk.f32.vlgmr.msrb.gmra.mxu0 %vm312_vm1, %v804_v16 }
 0x1ab   : > { %v335_v26 = vpop.f32.mrf.mxu1 }
 0x1ac   : > { %v339_v27 = vsel %vm338_vm2, %v335_v26, -inf }
 0x1ad   : > { %340 = vmax.xlane.f32.xlu0 %v339_v27 }
 0x1b5   : > { %v473_v28 = vpop.f32.mrf.mxu1 }
 0x1b6   : > { %v476_v29 = vsel %vm338_vm2, %v473_v28, -inf }
 0x1b7   : > { %477 = vmax.xlane.f32.xlu2 %v476_v29 }
 0x1b8   : > { %v544_v30 = vpop.f32.mrf.mxu0 }
 0x1b9   : > { %v402_v31 = vpop.f32.mrf.mxu3  ;;  %v547_v32 = vsel %vm338_vm2, %v544_v30, -inf }
 0x1ba   : > { %548 = vmax.xlane.f32.xlu0 %v547_v32  ;;  %v405_v33 = vsel %vm338_vm2, %v402_v31, -inf }
 0x1bb   : > { %406 = vmax.xlane.f32.xlu1 %v405_v33 }
 0x1c0   : > { %v615_v34 = vpop.f32.mrf.mxu1 }
 0x1c1   : > { %v618_v35 = vsel %vm338_vm2, %v615_v34, -inf }
 0x1c2   : > { %619 = vmax.xlane.f32.xlu2 %v618_v35  ;;  %v1570_v36 = vpop.f32.mrf.mxu0 }
 0x1c3   : > { %v689_v37 = vsel %vm338_vm2, %v1570_v36, -inf }
 0x1ca   : > { %v1575_v38 = vpop.f32.mrf.mxu1 }
 0x1cb   : > { %v1577_v39 = vpop.f32.mrf.mxu0  ;;  %v760_v40 = vsel %vm338_vm2, %v1575_v38, -inf }
 0x1cc   : > { %v831_v41 = vsel %vm338_vm2, %v1577_v39, -inf }
 0x1ce   : > { %556 = vrot.lane.b32.xlu0 %v1531_v7, %s1370_s11 }
 0x1d4   : > { %414 = vrot.lane.b32.xlu1 %v1531_v7, %s1371_s14 }
 0x1da   : > { %627 = vrot.lane.b32.xlu2 %v1531_v7, %s1372_s27  ;;  %s918_s27 = scalar_lea.hbm %s1648_s5, %s1051_s10 }
 0x1e2   : > { %698 = vrot.lane.b32.xlu2 %v1531_v7, %s1373_s28 }
 0x1ea   : > { %769 = vrot.lane.b32.xlu2 %v1531_v7, %s1374_s29 }
 0x1f2   : > { %840 = vrot.lane.b32.xlu2 %v1531_v7, %s1375_s30  ;;  %s274_s30 = scalar_lea.vmem [#allocation9], %s1020_s6  ;;  %s1297_s6 = scalar_lea.hbm %s1648_s5, 16 }
 0x1f8   : > { %690 = vmax.xlane.f32.xlu0 %v689_v37 }
 0x1fe   : > { %761 = vmax.xlane.f32.xlu1 %v760_v40 }
 0x200   : > { %832 = vmax.xlane.f32.xlu0 %v831_v41 }
 0x220   : > { %v341_v42 = vpop.xlane.xlu0 %340 }
 0x221   : > { %v342_v43 = vsub.f32 %v335_v26, %v341_v42 }
 0x223   : > { %v343_v44 = vmul.f32 1.442695, %v342_v43 }
 0x225   : > { %1155 = vpow2.f32 %v343_v44 }
 0x22a   : > { %v478_v45 = vpop.xlane.xlu2 %477 }
 0x22b   : > { %v1156_v46 = vpop.eup %1155  ;;  %v479_v47 = vsub.f32 %v473_v28, %v478_v45 }
 0x22c   : > { %1027 = vmatmul.msk.f32.vlgmr.msra.gmra.mxu2 %vm338_vm2, %v1156_v46  ;;  %v345_v48 = vsel %vm338_vm2, %v1156_v46, 0.0 }
 0x22d   : > { %v480_v49 = vmul.f32 1.442695, %v479_v47  ;;  %346 = vadd.xlane.f32.xlu0 %v345_v48  ;;  %v549_v50 = vpop.xlane.xlu0 %548 }
 0x22e   : > { %v407_v51 = vpop.xlane.xlu1 %406  ;;  %v550_v53 = vsub.f32 %v544_v30, %v549_v50 }
 0x22f   : > { %1157 = vpow2.f32 %v480_v49  ;;  %v408_v52 = vsub.f32 %v402_v31, %v407_v51 }
 0x230   : > { %v551_v56 = vmul.f32 1.442695, %v550_v53 }
 0x231   : > { %v409_v54 = vmul.f32 1.442695, %v408_v52 }
 0x233   : > { %1159 = vpow2.f32 %v409_v54 }
 0x234   : > { %1161 = vpow2.f32 %v551_v56 }
 0x235   : > { %v1158_v55 = vpop.eup %1157  ;;  %v620_v57 = vpop.xlane.xlu2 %619 }
 0x236   : > { %v621_v58 = vsub.f32 %v615_v34, %v620_v57  ;;  %1033 = vmatmul.msk.f32.vlgmr.msrb.gmra.mxu3 %vm338_vm2, %v1158_v55  ;;  %v482_v59 = vsel %vm338_vm2, %v1158_v55, 0.0 }
 0x237   : > { %483 = vadd.xlane.f32.xlu2 %v482_v59 }
 0x238   : > { %v622_v60 = vmul.f32 1.442695, %v621_v58 }
 0x239   : > { %v1160_v61 = vpop.eup %1159 }
 0x23a   : > { %1163 = vpow2.f32 %v622_v60  ;;  %v411_v62 = vsel %vm338_vm2, %v1160_v61, 0.0  ;;  %v1162_v0 = vpop.eup %1161  ;;  %v878_v60 = vld [vmem:[#allocation8 + $0x18] sm:$0xff] }
 0x23b   : > { %412 = vadd.xlane.f32.xlu1 %v411_v62  ;;  %v553_v3 = vsel %vm338_vm2, %v1162_v0, 0.0  ;;  %898 = vmatpush.msra.mxu1 %v878_v60  ;;  %v876_v62 = vld [vmem:[#allocation8 + $0x8] sm:$0xff] }
 0x23d   : > { %v628_v63 = vpop.permute.xlu2 %627 }
 0x23e   : > { %648 = vmatpush.msra.mxu3 %v628_v63  ;;  %v875_v63 = vld [vmem:[#allocation8] sm:$0xff] }
 0x240   : > { %v1164_v1 = vpop.eup %1163  ;;  %v557_v6 = vpop.permute.xlu0 %556 }
 0x241   : > { %1039 = vmatmul.msk.f32.vlgmr.msra.gmra.mxu3 %vm338_vm2, %v1164_v1  ;;  %v624_v2 = vsel %vm338_vm2, %v1164_v1, 0.0 }
 0x242   : > { %625 = vadd.xlane.f32.xlu0 %v624_v2 }
 0x243   : > { %554 = vadd.xlane.f32.xlu1 %v553_v3 }
 0x245   : > { %v699_v4 = vpop.permute.xlu2 %698 }
 0x246   : > { %v415_v5 = vpop.permute.xlu1 %414 }
 0x247   : > { %435 = vmatpush.msrb.mxu2 %v415_v5 }
 0x248   : > { %1030 = vmatmul.msk.f32.vlgmr.msrb.gmra.mxu2 %vm338_vm2, %v1160_v61  ;;  %v877_v61 = vld [vmem:[#allocation8 + $0x10] sm:$0xff] }
 0x249   : > { %577 = vmatpush.msra.mxu2 %v557_v6  ;;  %899 = vmatpush.msra.mxu1 %v877_v61 }
 0x24b   : > { %719 = vmatpush.msrb.mxu2 %v699_v4  ;;  %900 = vmatpush.msra.mxu1 %v876_v62  ;;  %v1154_v4 = vld [vmem:[%s1647_s4] ss:$0 sm:$0xff] }
 0x24d   : > { %v770_v7 = vpop.permute.xlu2 %769  ;;  %901 = vmatpush.msra.mxu1 %v875_v63 }
 0x24e   : > { %790 = vmatpush.msrb.mxu3 %v770_v7 }
 0x250   : > { %1036 = vmatmul.msk.f32.vlgmr.msra.gmra.mxu2 %vm338_vm2, %v1162_v0 }
 0x255   : > { %v841_v8 = vpop.permute.xlu2 %840 }
 0x256   : > { %861 = vmatpush.msra.mxu2 %v841_v8 }
 0x26b   : > { %v691_v9 = vpop.xlane.xlu0 %690 }
 0x26c   : > { %v692_v10 = vsub.f32 %v1570_v36, %v691_v9 }
 0x26e   : > { %v693_v11 = vmul.f32 1.442695, %v692_v10 }
 0x270   : > { %1165 = vpow2.f32 %v693_v11 }
 0x271   : > { %v762_v12 = vpop.xlane.xlu1 %761 }
 0x272   : > { %v763_v13 = vsub.f32 %v1575_v38, %v762_v12 }
 0x273   : > { %v833_v14 = vpop.xlane.xlu0 %832 }
 0x274   : > { %v764_v15 = vmul.f32 1.442695, %v763_v13  ;;  %v834_v16 = vsub.f32 %v1577_v39, %v833_v14 }
 0x276   : > { %v1166_v17 = vpop.eup %1165  ;;  %1167 = vpow2.f32 %v764_v15  ;;  %v835_v18 = vmul.f32 1.442695, %v834_v16 }
 0x277   : > { %1042 = vmatmul.msk.f32.vlgmr.msrb.gmra.mxu2 %vm338_vm2, %v1166_v17  ;;  %v695_v19 = vsel %vm338_vm2, %v1166_v17, 0.0 }
 0x278   : > { %1169 = vpow2.f32 %v835_v18  ;;  %696 = vadd.xlane.f32.xlu1 %v695_v19 }
 0x27c   : > { %v1168_v20 = vpop.eup %1167 }
 0x27d   : > { %1045 = vmatmul.msk.f32.vlgmr.msrb.gmra.mxu3 %vm338_vm2, %v1168_v20  ;;  %v766_v21 = vsel %vm338_vm2, %v1168_v20, 0.0 }
 0x27e   : > { %v1170_v22 = vpop.eup %1169  ;;  %767 = vadd.xlane.f32.xlu0 %v766_v21 }
 0x27f   : > { %1048 = vmatmul.msk.f32.vlgmr.msra.gmra.mxu2 %vm338_vm2, %v1170_v22  ;;  %v837_v23 = vsel %vm338_vm2, %v1170_v22, 0.0 }
 0x280   : > { %838 = vadd.xlane.f32.xlu1 %v837_v23 }
 0x2a0   : > { %v347_v24 = vpop.xlane.xlu0 %346 }
 0x2a1   : > { %1171 = vrcp.f32 %v347_v24 }
 0x2a7   : > { %v1172_v25 = vpop.eup %1171 }
 0x2aa   : > { %v484_v27 = vpop.xlane.xlu2 %483 }
 0x2ab   : > { %1173 = vrcp.f32 %v484_v27 }
 0x2ae   : > { %v413_v33 = vpop.xlane.xlu1 %412 }
 0x2af   : > { %v371_v26 = vpop.f32.mrf.mxu2 }
 0x2b0   : > { %v375_v28 = vmul.f32 %v1172_v25, %v371_v26 }
 0x2b1   : > { %v1174_v29 = vpop.eup %1173 }
 0x2b2   : > { %376 = vst.msk [vmem:[#allocation2] sm:$0xff] %vm312_vm1, %v375_v28 }
 0x2b5   : > { %v626_v32 = vpop.xlane.xlu0 %625 }
 0x2b6   : > { %1175 = vrcp.f32 %v626_v32  ;;  %v555_v37 = vpop.xlane.xlu1 %554 }
 0x2b7   : > { %1177 = vrcp.f32 %v413_v33 }
 0x2b8   : > { %1179 = vrcp.f32 %v555_v37 }
 0x2b9   : > { %v508_v30 = vpop.f32.mrf.mxu3 }
 0x2ba   : > { %v512_v31 = vmul.f32 %v1174_v29, %v508_v30 }
 0x2bc   : > { %514 = vrot.lane.b32.xlu0 %v512_v31, %s1376_s16  ;;  %v1176_v34 = vpop.eup %1175  ;;  %s920_s16 = sshll.u32 %s274_s30, 4  ;;  %s921_s16 = int_to_ptr.vmem [resolvable:$true] %s920_s16 }
 0x2bd   : > { %v1178_v38 = vpop.eup %1177 }
 0x2be   : > { %v1180_v41 = vpop.eup %1179 }
 0x2c4   : > { %v650_v35 = vpop.f32.mrf.mxu3 }
 0x2c5   : > { %v654_v36 = vmul.f32 %v1176_v34, %v650_v35 }
 0x2c7   : > { %656 = vrot.lane.b32.xlu0 %v654_v36, %s1377_s7  ;;  %s922_s7 = sshll.u32 %s918_s27, 4  ;;  %s923_s7 = int_to_ptr.hbm [resolvable:$true] %s922_s7 }
 0x2cb   : > { %v437_v39 = vpop.f32.mrf.mxu2 }
 0x2cc   : > { %v441_v40 = vmul.f32 %v1178_v38, %v437_v39 }
 0x2ce   : > { %443 = vrot.lane.b32.xlu1 %v441_v40, %s1378_s13  ;;  %s1291_s13 = sshra.s32 %s923_s7, 4  ;;  %s1292_s13 = int_to_ptr.hbm [resolvable:$true] %s1291_s13 }
 0x2cf   : > { %p1298_p12 = scmp.lt.s32.totalorder %s1292_s13, %s1648_s5 }
 0x2d3   : > { %v579_v42 = vpop.f32.mrf.mxu2 }
 0x2d4   : > { %v583_v43 = vmul.f32 %v1180_v41, %v579_v42 }
 0x2d6   : > { %585 = vrot.lane.b32.xlu2 %v583_v43, %s1379_s26  ;;  %s1293_s26 = scalar_lea.hbm %s1292_s13, 8 }
 0x2d7   : > { %p1294_p1 = scmp.ne.s32.totalorder %s1292_s13, %s1293_s26  ;;  %p1299_p7 = scmp.lt.s32.totalorder %s1297_s6, %s1293_s26 }
 0x2d9   : > { %p1295_p3 = pnand %p1294_p1, %p1482_p4  ;;  %p1300_p8 = por %p1299_p7, %p1298_p12 }
 0x2db   : > { %p1296_p5 = pneg %p1295_p3 }
 0x2dd   : > { %p1301_p9 = pnand %p1300_p8, %p1296_p5 }
 0x2eb   : > { %v697_v44 = vpop.xlane.xlu1 %696 }
 0x2ec   : > { %1181 = vrcp.f32 %v697_v44 }
 0x2f1   : > { %v768_v45 = vpop.xlane.xlu0 %767 }
 0x2f2   : > { %v1182_v47 = vpop.eup %1181  ;;  %1183 = vrcp.f32 %v768_v45 }
 0x2f3   : > { %v839_v46 = vpop.xlane.xlu1 %838 }
 0x2f4   : > { %1185 = vrcp.f32 %v839_v46 }
 0x2f8   : > { %v1184_v50 = vpop.eup %1183 }
 0x2fa   : > { %v721_v48 = vpop.f32.mrf.mxu2  ;;  %v1186_v53 = vpop.eup %1185 }
 0x2fb   : > { %v725_v49 = vmul.f32 %v1182_v47, %v721_v48 }
 0x2fd   : > { %727 = vrot.lane.b32.xlu1 %v725_v49, %s1380_s17 }
 0x300   : > { %v792_v51 = vpop.f32.mrf.mxu3 }
 0x301   : > { %v796_v52 = vmul.f32 %v1184_v50, %v792_v51 }
 0x302   : > { %v863_v54 = vpop.f32.mrf.mxu2 }
 0x303   : > { %v867_v55 = vmul.f32 %v1186_v53, %v863_v54  ;;  %798 = vrot.lane.b32.xlu0 %v796_v52, %s1381_s8 }
 0x305   : > { %869 = vrot.lane.b32.xlu1 %v867_v55, %s1382_s9 }
 0x32e   : > { %v515_v56 = vpop.permute.xlu0 %514 }
 0x330   : > { %v586_v58 = vpop.permute.xlu2 %585 }
 0x339   : > { %v657_v59 = vpop.permute.xlu0 %656 }
 0x340   : > { %v444_v57 = vpop.permute.xlu1 %443 }
 0x341   : > { %447 = vst.msk [vmem:[#allocation2] sm:$0xff] %vm446_vm3, %v444_v57 }
 0x342   : > { %518 = vst.msk [vmem:[#allocation2] sm:$0xff] %vm517_vm4, %v515_v56 }
 0x343   : > { %589 = vst.msk [vmem:[#allocation2] sm:$0xff] %vm588_vm5, %v586_v58 }
 0x344   : > { %660 = vst.msk [vmem:[#allocation2] sm:$0xff] %vm659_vm6, %v657_v59 }
 0x36f   : > { %v728_v0 = vpop.permute.xlu1 %727 }
 0x370   : > { %731 = vst.msk [vmem:[#allocation2] sm:$0xff] %vm730_vm7, %v728_v0 }
 0x375   : > { %v799_v1 = vpop.permute.xlu0 %798 }
 0x376   : > { %802 = vst.msk [vmem:[#allocation2] sm:$0xff] %vm801_vm8, %v799_v1 }
 0x377   : > { %v870_v2 = vpop.permute.xlu1 %869 }
 0x378   : > { %873 = vst.msk [vmem:[#allocation2] sm:$0xff] %vm872_vm9, %v870_v2 }
 0x37f   : > { %v874_v3 = vld [vmem:[#allocation2] sm:$0xff] }
 0x380   : > { %1049 = vmatmul.msk.f32.vlgmr.msra.gmra.mxu1 %vm284_vm0, %v874_v3 }
 0x3fd   : > { %v903_v5 = vpop.f32.mrf.mxu1 }
 0x3fe   : > { %v904_v6 = vadd.f32 %v1154_v4, %v903_v5 }
 0x400   : > { %906 = vst.msk [vmem:[%s274_s30] sm:$0xff] %vm284_vm0, %v904_v6 }
 0x401   : > { %1304 = shalt.err (!%p1301_p9)
}
 0x402   : > { %1064 = dma.vmem_to_hbm [thread:$0]  (%p1482_p4), %s921_s16, 128, %s923_s7, %s908_s25  }
 0x403 PF: > { %s934_s22 = sand.u32 1, %s1335_s18   ;;  %p1655_p10 = scmp.ge.s32.totalorder %s1347_s21, 2 }
 0x404   : > { %s935_s11 = scalar_lea.sflag [#allocation5], %s934_s22 }
 0x405   : > { %p1078_p13 = pnand %p1655_p10, %p1486_p6 }
 0x407   : > { %p1079_p11 = pneg %p1078_p13 }
 0x409   : > { %1330 = dma.done.wait (%p1079_p11), %s935_s11, 128  }
 0x40a   : > { %1332 = vsyncadd (%p1079_p11), %s935_s11, 4294967168  ;;  %p19_p0 = scmp.ge.s32.totalorder %s1456_s12, 4   ;;  %s1656_s18 = smov %s1339_s19 }
 0x40b   : > { %s1657_s19 = smov %s1343_s20  ;;  %s1658_s20 = smov %s1467_s15 }
 0x40c   : > { %s1659_s21 = smov %s1456_s12  ;;  %21 = sbr.rel (!%p19_p0) target bundleno = 6 (0x6), region = 93 }
 0x411   :  { %941 = vsyncpa [#allocation4], 1 }
 0x412   :  { %943 = vsyncpa [#allocation4 + $0x1], 1 }
 0x413   :  { %944 = vsyncpa [#allocation7], 1 }
 0x414   :  { %945 = vsyncpa [#allocation5], 1 }
 0x415   :  { %947 = vsyncpa [#allocation5 + $0x1], 1 }

</bundles_post_ra>
